<compile_context>
chip_gen: v5e
topology: v5e:2x2
jax: 0.10.0
libtpu: 0.0.40
codegen_flags: <defaults>
</compile_context>

<pallas_src>
import functools

import jax
import jax.numpy as jnp
from jax.experimental import pallas as pl
from jax.experimental.pallas import tpu as pltpu

_I32_MAX = 2147483647


def _round_up(x, m):
    return ((x + m - 1) // m) * m


def _prefix_include(row_max_f32, conf, tile_idx, tile_n, k, stop_ref):
    """Early-exit prefix mask for this tile; updates the carried stop flag."""
    gidx = (jax.lax.broadcasted_iota(jnp.int32, (1, tile_n), 1)
            + tile_idx * tile_n)                                   # (1, T)
    in_range = gidx < k            # also masks edge-block garbage lanes
    fail = jnp.logical_and(row_max_f32 < conf, in_range)
    first_fail = jnp.min(jnp.where(fail, gidx, jnp.int32(_I32_MAX)))
    include = jnp.logical_and(in_range, gidx < first_fail)
    stop_ref[0] = (first_fail < jnp.int32(_I32_MAX)).astype(jnp.int32)
    return include


def _class_kernel(conf_ref, scores_ref, out_ref, acc_ref, stop_ref, *, k, tile_n):
    i = pl.program_id(0)

    @pl.when(i == 0)
    def _():
        acc_ref[...] = jnp.zeros_like(acc_ref)
        stop_ref[0] = jnp.int32(0)

    @pl.when(stop_ref[0] == 0)
    def _():
        # Reduce in the input dtype; upcast only the (1, T) result.
        row_max = jnp.max(scores_ref[...], axis=0, keepdims=True).astype(jnp.float32)
        include = _prefix_include(row_max, conf_ref[0], i, tile_n, k, stop_ref)
        acc_ref[...] += jnp.where(include, row_max, 0.0)

    @pl.when(i == pl.num_programs(0) - 1)
    def _():
        out_ref[0] = jnp.sum(acc_ref[...])


def _box_kernel(conf_ref, scores_ref, boxes_ref, out_ref, acc_ref, stop_ref,
                *, k, tile_n):
    i = pl.program_id(0)

    @pl.when(i == 0)
    def _():
        acc_ref[...] = jnp.zeros_like(acc_ref)
        stop_ref[0] = jnp.int32(0)

    @pl.when(stop_ref[0] == 0)
    def _():
        row_max = jnp.max(scores_ref[...], axis=0, keepdims=True).astype(jnp.float32)
        include = _prefix_include(row_max, conf_ref[0], i, tile_n, k, stop_ref)
        box_sum = jnp.sum(boxes_ref[...].astype(jnp.float32), axis=0,
                          keepdims=True)                            # (1, T)
        acc_ref[...] += jnp.where(include, box_sum, 0.0)

    @pl.when(i == pl.num_programs(0) - 1)
    def _():
        out_ref[0] = jnp.sum(acc_ref[...])


def yolov5_target_forward(post_result, pre_post_boxes, *, output_type, conf,
                          ratio, max_tile=16384):
    """Pallas equivalent of yolov5_target(output_type, conf, ratio)((post, boxes))."""
    n, c = post_result.shape
    # NOTE: the PyTorch reference would raise IndexError for ratio > 1; we clamp.
    k = min(int(n * ratio), n)
    do_class = output_type in ("class", "all")
    do_box = (not do_class) and (output_type == "box")
    if k <= 0 or not (do_class or do_box):
        return jnp.float32(0.0)

    # Only the first k detections can ever contribute: slice BEFORE the layout
    # transpose so both the transpose pass and the kernel stream k rows, not N.
    # Lane-dense layout: detections live on the 128-wide lane axis, so the
    # class max / box sum are cheap sublane reductions.
    # TODO(synk): the transpose is still one read+write HBM pass; ideally the
    # detection head emits scores already as (C, N) so it disappears entirely.
    scores_t = jnp.transpose(post_result[:k, 1:])                   # (C-1, k)

    # Tile sizing against a ~12 MiB double-buffered VMEM budget (safe under
    # the 16 MiB v5e scoped default; v6e/v7x have more headroom).
    itemsize = jnp.dtype(post_result.dtype).itemsize
    bytes_per_det = (c - 1) * itemsize * 2 + 4           # dbl-buffered scores + acc
    if do_box:
        bytes_per_det += 4 * jnp.dtype(pre_post_boxes.dtype).itemsize * 2
    budget = 12 * 1024 * 1024
    tile_cap = max(128, min(int(max_tile), (budget // bytes_per_det) // 128 * 128))

    if _round_up(k, 128) <= tile_cap:
        tile_n, num_tiles = k, 1                 # full-extent block: no OOB lanes
    else:
        tile_n, num_tiles = tile_cap, pl.cdiv(k, tile_cap)   # edge block masked

    conf_arr = jnp.asarray([conf], dtype=jnp.float32)
    smem_spec = pl.BlockSpec(memory_space=pltpu.MemorySpace.SMEM)
    score_spec = pl.BlockSpec((c - 1, tile_n), lambda i: (0, i))

    if do_class:
        kernel = functools.partial(_class_kernel, k=k, tile_n=tile_n)
        operands = (conf_arr, scores_t)
        in_specs = [smem_spec, score_spec]
    else:  # 'box'
        boxes_t = jnp.transpose(pre_post_boxes[:k])                 # (4, k)
        kernel = functools.partial(_box_kernel, k=k, tile_n=tile_n)
        operands = (conf_arr, scores_t, boxes_t)
        in_specs = [smem_spec, score_spec,
                    pl.BlockSpec((4, tile_n), lambda i: (0, i))]

    # TODO(synk): if early breaks are common at scale, switch the tiled inputs
    # to memory_space=pl.ANY with a manual double-buffered make_async_copy loop
    # whose next-tile fetch is gated on stop==0, so the break also stops DMA;
    # BlockSpec pipelining here only skips the (already cheap) VPU work.
    out = pl.pallas_call(
        kernel,
        out_shape=jax.ShapeDtypeStruct((1,), jnp.float32),
        grid=(num_tiles,),
        in_specs=in_specs,
        out_specs=pl.BlockSpec(memory_space=pltpu.MemorySpace.SMEM),
        scratch_shapes=[pltpu.VMEM((1, tile_n), jnp.float32),   # lane-wide partials
                        pltpu.SMEM((1,), jnp.int32)],           # early-exit flag
        compiler_params=pltpu.CompilerParams(
            dimension_semantics=("arbitrary",),                 # sequential carry
            vmem_limit_bytes=32 * 1024 * 1024),
    )(*operands)
    return out[0]


if __name__ == "__main__":
    import numpy as np

    def ref(post, boxes, output_type, conf, ratio):
        post = np.asarray(post, dtype=np.float64)
        boxes = np.asarray(boxes, dtype=np.float64)
        total = 0.0
        for i in range(min(int(post.shape[0] * ratio), post.shape[0])):
            m = float(post[i, 1:].max())
            if m < conf:
                break
            if output_type in ("class", "all"):
                total += m
            elif output_type == "box":
                total += float(boxes[i].sum())
        return total

    key = jax.random.PRNGKey(0)
    k1, k2, k3, k4 = jax.random.split(key, 4)

    # Small case: 16 detections, column 0 + 7 class scores (single-tile path).
    N1, C1 = 16, 8
    post1 = jax.random.uniform(k1, (N1, C1), dtype=jnp.float32)
    boxes1 = jax.random.uniform(k2, (N1, 4), dtype=jnp.float32) * 32.0

    # Larger case with max_tile=128: exercises the multi-tile grid, edge-block
    # masking and the early break (conf=0.9 makes a break likely).
    N2, C2 = 300, 12
    post2 = jax.random.uniform(k3, (N2, C2), dtype=jnp.float32)
    boxes2 = jax.random.uniform(k4, (N2, 4), dtype=jnp.float32) * 32.0

    cases = [
        (post1, boxes1, "class", 0.3, 0.5, 16384),
        (post1, boxes1, "all",   0.3, 0.5, 16384),
        (post1, boxes1, "box",   0.3, 0.5, 16384),
        (post2, boxes2, "class", 0.9, 0.7, 128),
        (post2, boxes2, "box",   0.9, 0.7, 128),
        (post2, boxes2, "class", 0.3, 1.0, 128),
    ]

    ok = True
    for post, boxes, ot, cf, rt, mt in cases:
        got = yolov5_target_forward(post, boxes, output_type=ot, conf=cf,
                                    ratio=rt, max_tile=mt)
        got = float(jax.block_until_ready(got))
        want = ref(post, boxes, ot, cf, rt)
        if not np.isclose(got, want, rtol=1e-5, atol=1e-3):
            ok = False
            print(f"MISMATCH type={ot} conf={cf} ratio={rt}: got {got}, want {want}")

    if ok:
        print("KERNEL_OK")
</pallas_src>

<mosaic_0001>
module attributes {stable_mosaic.version = 11 : i64} {
  func.func @_class_kernel(%arg0: i32, %arg1: memref<1xf32, #tpu.memory_space<smem>>, %arg2: memref<7x8xf32, #tpu.memory_space<vmem>>, %arg3: memref<1xf32, #tpu.memory_space<smem>>, %arg4: memref<1x8xf32, #tpu.memory_space<vmem>>, %arg5: memref<1xi32, #tpu.memory_space<smem>>) attributes {dimension_semantics = [#tpu.dimension_semantics<arbitrary>], iteration_bounds = array<i64: 1>, scalar_prefetch = 0 : i64, scratch_operands = 2 : i64, tpu.core_type = #tpu.core_type<tc>, window_params = [{transform_indices = @transform_0, window_bounds = array<i64: 1>}, {transform_indices = @transform_1, window_bounds = array<i64: 7, 8>}, {transform_indices = @transform_2, window_bounds = array<i64: 1>}]} {
    %c0_i32 = arith.constant 0 : i32
    %0 = arith.cmpi eq, %arg0, %c0_i32 : i32
    %1 = arith.extui %0 : i1 to i32
    %c0_i32_0 = arith.constant 0 : i32
    %2 = arith.cmpi ne, %1, %c0_i32_0 : i32
    scf.if %2 {
      %cst = arith.constant 0.000000e+00 : f32
      %10 = vector.broadcast %cst : f32 to vector<1x8xf32>
      %c0_5 = arith.constant 0 : index
      %c0_6 = arith.constant 0 : index
      %11 = vector.load %arg4[%c0_5, %c0_6] : memref<1x8xf32, #tpu.memory_space<vmem>>, vector<1x8xf32>
      tpu.vector_store %arg4[%c0_5, %c0_6], %10 {strides = array<i32>} : memref<1x8xf32, #tpu.memory_space<vmem>>, vector<1x8xf32>,
      %c0_i32_7 = arith.constant 0 : i32
      %c0_8 = arith.constant 0 : index
      %12 = memref.load %arg5[%c0_8] : memref<1xi32, #tpu.memory_space<smem>>
      memref.store %c0_i32_7, %arg5[%c0_8] : memref<1xi32, #tpu.memory_space<smem>>
    } else {
    }
    %c0 = arith.constant 0 : index
    %3 = memref.load %arg5[%c0] : memref<1xi32, #tpu.memory_space<smem>>
    %c0_i32_1 = arith.constant 0 : i32
    %4 = arith.cmpi eq, %3, %c0_i32_1 : i32
    %5 = arith.extui %4 : i1 to i32
    %c0_i32_2 = arith.constant 0 : i32
    %6 = arith.cmpi ne, %5, %c0_i32_2 : i32
    scf.if %6 {
      %c0_5 = arith.constant 0 : index
      %c0_6 = arith.constant 0 : index
      %10 = vector.load %arg2[%c0_5, %c0_6] : memref<7x8xf32, #tpu.memory_space<vmem>>, vector<7x8xf32>
      %cst = arith.constant dense<0xFF800000> : vector<8xf32>
      %11 = vector.multi_reduction <maximumf>, %10, %cst [0] : vector<7x8xf32> to vector<8xf32>
      %12 = vector.shape_cast %11 : vector<8xf32> to vector<1x8xf32>
      %c0_7 = arith.constant 0 : index
      %13 = memref.load %arg1[%c0_7] : memref<1xf32, #tpu.memory_space<smem>>
      %14 = tpu.iota {dimensions = array<i32: 1>} : vector<1x8xi32>
      %c8_i32 = arith.constant 8 : i32
      %15 = arith.muli %arg0, %c8_i32 : i32
      %16 = vector.broadcast %15 : i32 to vector<1x8xi32>
      %17 = arith.addi %14, %16 : vector<1x8xi32>
      %c8_i32_8 = arith.constant 8 : i32
      %18 = vector.broadcast %c8_i32_8 : i32 to vector<1x8xi32>
      %19 = arith.cmpi slt, %17, %18 : vector<1x8xi32>
      %20 = vector.broadcast %13 : f32 to vector<1x8xf32>
      %21 = arith.cmpf olt, %12, %20 : vector<1x8xf32>
      %22 = arith.andi %21, %19 : vector<1x8xi1>
      %c2147483647_i32 = arith.constant 2147483647 : i32
      %23 = vector.broadcast %c2147483647_i32 : i32 to vector<1x8xi32>
      %24 = arith.select %22, %17, %23 : vector<1x8xi1>, vector<1x8xi32>
      %25 = vector.shape_cast %24 : vector<1x8xi32> to vector<1x1x8xi32>
      %cst_9 = arith.constant dense<2147483647> : vector<1xi32>
      %26 = vector.multi_reduction <minsi>, %25, %cst_9 [1, 2] : vector<1x1x8xi32> to vector<1xi32>
      %27 = vector.shape_cast %26 : vector<1xi32> to vector<1x1x1xi32>
      %28 = vector.extract %27[0, 0, 0] : i32 from vector<1x1x1xi32>
      %29 = vector.broadcast %28 : i32 to vector<1x8xi32>
      %30 = arith.cmpi slt, %17, %29 : vector<1x8xi32>
      %31 = arith.andi %19, %30 : vector<1x8xi1>
      %c2147483647_i32_10 = arith.constant 2147483647 : i32
      %32 = arith.cmpi slt, %28, %c2147483647_i32_10 : i32
      %33 = arith.extui %32 : i1 to i32
      %c0_11 = arith.constant 0 : index
      %34 = memref.load %arg5[%c0_11] : memref<1xi32, #tpu.memory_space<smem>>
      memref.store %33, %arg5[%c0_11] : memref<1xi32, #tpu.memory_space<smem>>
      %c0_12 = arith.constant 0 : index
      %c0_13 = arith.constant 0 : index
      %35 = vector.load %arg4[%c0_12, %c0_13] : memref<1x8xf32, #tpu.memory_space<vmem>>, vector<1x8xf32>
      %cst_14 = arith.constant 0.000000e+00 : f32
      %36 = vector.broadcast %cst_14 : f32 to vector<1x8xf32>
      %37 = arith.select %31, %12, %36 : vector<1x8xi1>, vector<1x8xf32>
      %38 = arith.addf %35, %37 : vector<1x8xf32>
      %c0_15 = arith.constant 0 : index
      %c0_16 = arith.constant 0 : index
      %39 = vector.load %arg4[%c0_15, %c0_16] : memref<1x8xf32, #tpu.memory_space<vmem>>, vector<1x8xf32>
      tpu.vector_store %arg4[%c0_15, %c0_16], %38 {strides = array<i32>} : memref<1x8xf32, #tpu.memory_space<vmem>>, vector<1x8xf32>,
    } else {
    }
    %c0_i32_3 = arith.constant 0 : i32
    %7 = arith.cmpi eq, %arg0, %c0_i32_3 : i32
    %8 = arith.extui %7 : i1 to i32
    %c0_i32_4 = arith.constant 0 : i32
    %9 = arith.cmpi ne, %8, %c0_i32_4 : i32
    scf.if %9 {
      %c0_5 = arith.constant 0 : index
      %c0_6 = arith.constant 0 : index
      %10 = vector.load %arg4[%c0_5, %c0_6] : memref<1x8xf32, #tpu.memory_space<vmem>>, vector<1x8xf32>
      %11 = vector.shape_cast %10 : vector<1x8xf32> to vector<1x1x8xf32>
      %cst = arith.constant dense<0.000000e+00> : vector<1xf32>
      %12 = vector.multi_reduction <add>, %11, %cst [1, 2] : vector<1x1x8xf32> to vector<1xf32>
      %13 = vector.shape_cast %12 : vector<1xf32> to vector<1x1x1xf32>
      %14 = vector.extract %13[0, 0, 0] : f32 from vector<1x1x1xf32>
      %c0_7 = arith.constant 0 : index
      %15 = memref.load %arg3[%c0_7] : memref<1xf32, #tpu.memory_space<smem>>
      memref.store %14, %arg3[%c0_7] : memref<1xf32, #tpu.memory_space<smem>>
    } else {
    }
    return
  }
  func.func @transform_0(%arg0: i32) -> i32 {
    %c0_i32 = arith.constant 0 : i32
    %c0_i32_0 = arith.constant 0 : i32
    return %c0_i32 : i32
  }
  func.func @transform_1(%arg0: i32) -> (i32, i32) {
    %c0_i32 = arith.constant 0 : i32
    %c0_i32_0 = arith.constant 0 : i32
    return %c0_i32, %arg0 : i32, i32
  }
  func.func @transform_2(%arg0: i32) -> i32 {
    %c0_i32 = arith.constant 0 : i32
    %c0_i32_0 = arith.constant 0 : i32
    return %c0_i32 : i32
  }
}

</mosaic_0001>

<bundles_post_ra>
// kernel: tpu_custom_call.1
= control target key start
LH: loop header
LB: loop body
LE: loop exit
PB: predicated region body
PF: predicated region fallthrough
CT: control target
= control target key end

     0   :  { %s205_s0 = inlined_call_operand.<no memory space> [shape: f32[1], index: 0, kind: input, shape index: {}]   ;;  %s206_s1 = inlined_call_operand.hbm [shape: f32[7,8], index: 1, kind: input, shape index: {}]   ;;  %s207_s2 = inlined_call_operand.hbm [shape: f32[1], index: 2, kind: output, shape index: {}]  }
   0x1   :  { %7 = sst [smem:[#allocation4]] %s205_s0 }
   0x2   :  { %8 = vsyncpa [#allocation6], 0 }
   0x3   :  { %9 = vsyncpa [#allocation7], 0  ;;  %s17_s13 = sshll.u32 %s206_s1, 4  ;;  %s172_s14 = smov [#allocation5]   ;;  %s18_s13 = int_to_ptr.hbm [resolvable:$true] %s17_s13 }
   0x4   :  { %s19_s15 = sshll.u32 %s172_s14, 4  ;;  %s20_s15 = int_to_ptr.vmem [resolvable:$true] %s19_s15 }
   0x5   :  { %22 = dma.hbm_to_vmem [thread:$0]  %s18_s13, 128, %s20_s15, [#allocation6]  }
   0x6   :  { %168 = dma.done.wait [#allocation6], 128  }
   0x7   :  { %169 = vsyncadd [#allocation6], 4294967168  ;;  %vm31_vm0 = vcmask 57344   ;;  %s173_s16 = smov 0   ;;  %v174_v0 = vmov 0.0   ;;  %vm41_vm1 = vcmask 63488   ;;  %v50_v5 = vlaneseq }
   0x8   :  { %34 = sst [smem:[#allocation3]] %s173_s16  ;;  %32 = vst.msk [vmem:[#allocation2] sm:$0x1] %vm31_vm0, %v174_v0  ;;  %v40_v1 = vld [vmem:[#allocation5] sm:$0x7f]  ;;  %vm60_vm4 = vcmask 64512  }
   0x9   :  { %v42_v2 = vsel %vm41_vm1, %v40_v1, -inf  ;;  %s49_s0 = sld [smem:[#allocation4]]  ;;  %v51_v8 = vand.u32 127, %v50_v5  ;;  %s111_s20 = sshll.u32 %s207_s2, 4  ;;  %s112_s20 = int_to_ptr.hbm [resolvable:$true] %s111_s20 }
   0xa   :  { %v43_v3 = vrot.slane %v42_v2, 4  ;;  %s175_s22 = smov [#allocation8]  }
   0xb   :  { %vm55_vm2 = vcmp.lt.s32.totalorder %v51_v8, 8 }
   0xc   :  { %v44_v4 = vmax.f32 %v42_v2, %v43_v3 }
   0xe   :  { %v45_v6 = vrot.slane %v44_v4, 2 }
   0xf   :  { %v56_v10 = vstv %s49_s0  ;;  %v84_v26 = vld [vmem:[#allocation2] sm:$0x1] }
  0x10   :  { %v46_v7 = vmax.f32 %v44_v4, %v45_v6 }
  0x12   :  { %v47_v9 = vrot.slane %v46_v7, 1 }
  0x14   :  { %v48_v11 = vmax.f32 %v46_v7, %v47_v9 }
  0x16   :  { %vm57_vm3 = vcmp.lt.f32.partialorder %v48_v11, %v56_v10 }
  0x17   :  { %vm58_vm5 = vmand %vm57_vm3, %vm55_vm2 }
  0x18   :  { %v59_v12 = vsel %vm58_vm5, %v51_v8, 2147483647 }
  0x19   :  { %v61_v13 = vsel %vm60_vm4, %v59_v12, 2147483647 }
  0x1a   :  { %v63_v14 = vshra.s32 %v61_v13, 16  ;;  %v62_v16 = vand.u32 65535, %v61_v13 }
  0x1c   :  { %v65_v15 = vcvt.s32.f32 %v63_v14  ;;  %v64_v17 = vcvt.s32.f32 %v62_v16 }
  0x1e   :  { %66 = vmin.xlane.f32.xlu0 %v65_v15 }
  0x91   :  { %v67_v18 = vpop.xlane.xlu0 %66 }
  0x92   :  { %vm68_vm6 = vcmp.eq.f32.partialorder %v65_v15, %v67_v18  ;;  %v73_v20 = vcvt.f32.s32 %v67_v18 }
  0x93   :  { %v69_v19 = vsel %vm68_vm6, %v64_v17, inf }
  0x94   :  { %70 = vmin.xlane.f32.xlu0 %v69_v19  ;;  %v74_v23 = vshll.u32 %v73_v20, 16 }
 0x107   :  { %v71_v21 = vpop.xlane.xlu0 %70 }
 0x108   :  { %v72_v22 = vcvt.f32.s32 %v71_v21 }
 0x10a   :  { %v75_v24 = vadd.s32 %v74_v23, %v72_v22 }
 0x10c   :  { %123 = vpush %v75_v24 }
 0x13d   :  { %s124_s1 = spop %123 }
 0x13e   :  { %v77_v25 = vstv %s124_s1  ;;  %p80_p0 = scmp.lt.s32.totalorder %s124_s1, 2147483647 }
 0x13f   :  { %vm78_vm7 = vcmp.lt.s32.totalorder %v51_v8, %v77_v25 }
 0x140   :  { %vm79_vm8 = vmand %vm55_vm2, %vm78_vm7  ;;  %s81_s17 = scalar_select %p80_p0, 1, 0 }
 0x141   :  { %v85_v27 = vsel %vm79_vm8, %v48_v11, 0.0 }
 0x142   :  { %83 = sst [smem:[#allocation3]] %s81_s17  ;;  %v86_v28 = vadd.f32 %v85_v27, %v84_v26 }
 0x144   :  { %88 = vst.msk [vmem:[#allocation2] sm:$0x1] %vm31_vm0, %v86_v28 }
 0x14b   :  { %v92_v29 = vld [vmem:[#allocation2] sm:$0x1] }
 0x14c   :  { %v94_v30 = vsel %vm31_vm0, %v92_v29, 0.0 }
 0x14d   :  { %95 = vadd.xlane.f32.xlu0 %v94_v30 }
 0x1c0   :  { %v96_v31 = vpop.xlane.xlu0 %95 }
 0x1c1   :  { %v97_v32 = vrot.slane %v96_v31, 4 }
 0x1c3   :  { %v98_v33 = vadd.f32 %v97_v32, %v96_v31 }
 0x1c5   :  { %v99_v34 = vrot.slane %v98_v33, 2 }
 0x1c7   :  { %v100_v35 = vadd.f32 %v99_v34, %v98_v33 }
 0x1c9   :  { %v101_v36 = vrot.slane %v100_v35, 1 }
 0x1cb   :  { %v102_v37 = vadd.f32 %v101_v36, %v100_v35 }
 0x1cd   :  { %125 = vpush %v102_v37 }
 0x1fe   :  { %s126_s21 = spop %125 }
 0x1ff   :  { %105 = sst [smem:[#allocation8]] %s126_s21 }
 0x200   :  { %114 = dma.smem_to_hbm %s175_s22, 16, %s112_s20, [#allocation7]  }
 0x201   :  { %170 = dma.done.wait [#allocation7], 16  }
 0x202   :  { %171 = vsyncadd [#allocation7], 4294967280 }
 0x203   :  { %119 = sfence }
 0x204   :  { %120 = vsyncpa [#allocation6], 1 }
 0x205   :  { %121 = vsyncpa [#allocation7], 1 }

</bundles_post_ra>
